<compile_context>
chip_gen: v6e
topology: v6e:2x2x1
jax: 0.10.0
libtpu: 0.0.40
codegen_flags: <defaults>
</compile_context>

<pallas_src>
import functools

import jax
import jax.numpy as jnp
import numpy as np
from jax.experimental import pallas as pl
from jax.experimental.pallas import tpu as pltpu


def _fused_conv_relu_residual_kernel(x_ref, w_ref, bc_ref, bs_ref, o_ref,
                                     patch_ref, *, K, pad, H, W):
    """One grid step processes B images.

    x_ref     : (B, Cin_p, L)        bf16, L = (H+2*pad)*W + 2*pad
                                     (H zero-padded, spatial flattened, +-pad lane pad)
    w_ref     : (2*Cout, K*K*Cin_p)  bf16   rows [0,Cout)      = conv taps
                                            rows [Cout,2*Cout) = 1x1 shortcut (center-tap cols)
    bc_ref    : (Cout, 1)            f32    conv bias
    bs_ref    : (Cout, 1)            f32    shortcut bias
    o_ref     : (B, Cout, S)         f32,   S = H*W  (lane-dense output)
    patch_ref : (K*K*Cin_p, B*S)     bf16   VMEM scratch (im2col patch matrix)
    """
    S = H * W
    B = x_ref.shape[0]
    Cin_p = x_ref.shape[1]
    Cout = o_ref.shape[1]

    # Width-edge masks, hoisted: one pre-broadcast (Cin_p, S) mask per distinct
    # nonzero width shift dw in [-pad, pad].  Applied pre-dot on bf16 taps.
    col = jax.lax.broadcasted_iota(jnp.int32, (1, S), 1) % W
    masks = {
        dw: jnp.broadcast_to((col + dw >= 0) & (col + dw < W), (Cin_p, S))
        for dw in range(-pad, pad + 1) if dw != 0
    }

    # Build the (K*K*Cin_p, B*S) patch matrix once.  The K*K unaligned lane
    # shifts are paid here into scratch; the MXU then streams from it with one
    # contiguous weight operand.  All stores are native-tile aligned
    # (sublane offset multiple of 16 for bf16, lane offset multiple of 128).
    for b in range(B):
        for kh in range(K):
            for kw in range(K):
                dw = kw - pad                       # width shift in [-pad, pad]
                start = kh * W + kw                 # static slice start, >= 0
                tap = x_ref[b, :, start:start + S]  # (Cin_p, S) bf16
                if dw != 0:
                    # Lanes whose shifted source column falls outside [0, W)
                    # are the zero 'same' padding.
                    tap = jnp.where(masks[dw], tap, jnp.zeros_like(tap))
                r0 = (kh * K + kw) * Cin_p
                patch_ref[r0:r0 + Cin_p, b * S:(b + 1) * S] = tap

    # Single fused MXU matmul: all K*K conv taps AND the 1x1 shortcut.
    res = jnp.dot(w_ref[...], patch_ref[...],
                  preferred_element_type=jnp.float32)   # (2*Cout, B*S) f32

    # f32 epilogue (v5e-friendly): conv bias + ReLU + shortcut bias + residual.
    conv = jnp.maximum(res[:Cout] + bc_ref[...], 0.0)
    out = conv + res[Cout:] + bs_ref[...]

    for b in range(B):
        o_ref[b] = out[:, b * S:(b + 1) * S].astype(o_ref.dtype)


def prepare_conv_node_params(w_conv, b_conv, w_sc, b_sc,
                             *, compute_dtype=jnp.bfloat16):
    """One-time weight relayout (hoisted out of the per-forward path).

    w_conv : [K, K, Cin, Cout] (HWIO)    b_conv : [Cout]
    w_sc   : [Cin, Cout] (1x1 shortcut)  b_sc   : [Cout]

    Returns (w_all, bc, bs):
      w_all : (2*Cout, K*K*Cin_p) compute_dtype fused weight slab
              rows [0, Cout)       : conv taps, tap-major, Cin_p within tap
              rows [Cout, 2*Cout)  : shortcut weights in the center-tap cols
      bc, bs: (Cout, 1) f32 biases.
    """
    K = w_conv.shape[0]
    Cin, Cout = w_conv.shape[2], w_conv.shape[3]
    pad = K // 2
    # Pad channels to the sublane tile of the compute dtype (16 for bf16) so
    # in-kernel patch-matrix stores are native-tile aligned.
    sub = 8 * max(1, 4 // jnp.dtype(compute_dtype).itemsize)
    Cin_p = ((Cin + sub - 1) // sub) * sub

    # Conv rows: (Cout, K, K, Cin_p) -> (Cout, K*K*Cin_p).
    wt = jnp.transpose(w_conv, (3, 0, 1, 2))                       # (Cout,K,K,Cin)
    wt = jnp.pad(wt, ((0, 0), (0, 0), (0, 0), (0, Cin_p - Cin)))
    conv_rows = wt.reshape(Cout, K * K * Cin_p)

    # Shortcut rows: w_sc placed at the center-tap columns, zeros elsewhere.
    ws = jnp.pad(jnp.transpose(w_sc, (1, 0)), ((0, 0), (0, Cin_p - Cin)))
    center = pad * K + pad
    sc_rows = jnp.zeros((Cout, K * K, Cin_p), w_sc.dtype)
    sc_rows = sc_rows.at[:, center, :].set(ws)
    sc_rows = sc_rows.reshape(Cout, K * K * Cin_p)

    w_all = jnp.concatenate([conv_rows, sc_rows], axis=0).astype(compute_dtype)
    bc = b_conv.reshape(Cout, 1).astype(jnp.float32)
    bs = b_sc.reshape(Cout, 1).astype(jnp.float32)
    return w_all, bc, bs


@functools.partial(jax.jit, static_argnames=("K", "grid_steps"))
def conv_node_forward(x_nchw, w_all, bc, bs, *, K, grid_steps=1):
    """Forward pass of PyTorchConvNode (stride=1, padding='same').

    x_nchw     : [N, Cin, H, W]  (PyTorch NCHW)
    w_all/bc/bs: outputs of prepare_conv_node_params (hoisted relayout)
    grid_steps : 1 on single-TC v5e/v6e (whole batch per step);
                 2 on dual-TC v7x so both TensorCores get work.
    returns    : [N, Cout, H, W]
    """
    N, Cin, H, W = x_nchw.shape
    assert K % 2 == 1, "padding='same' emulation assumes odd kernel size"
    pad = K // 2
    S = H * W
    Cout = bc.shape[0]
    Cin_p = w_all.shape[1] // (K * K)
    compute_dtype = w_all.dtype

    G = grid_steps
    assert N % G == 0, "grid_steps must divide the batch size"
    B = N // G

    # Activation prep (all fused under this jit): pad channels + H rows,
    # flatten spatial (lane axis = (H+2p)*W), +-pad lane pad so width-shifted
    # slices stay in bounds, cast MXU input to bf16.
    xh = jnp.pad(x_nchw, ((0, 0), (0, Cin_p - Cin), (pad, pad), (0, 0)))
    x_flat = xh.reshape(N, Cin_p, (H + 2 * pad) * W)
    x_flat = jnp.pad(x_flat, ((0, 0), (0, 0), (pad, pad))).astype(compute_dtype)
    L = (H + 2 * pad) * W + 2 * pad

    kernel = functools.partial(_fused_conv_relu_residual_kernel,
                               K=K, pad=pad, H=H, W=W)

    out = pl.pallas_call(
        kernel,
        out_shape=jax.ShapeDtypeStruct((N, Cout, S), x_nchw.dtype),
        grid_spec=pltpu.PrefetchScalarGridSpec(
            num_scalar_prefetch=0,
            grid=(G,),
            in_specs=[
                pl.BlockSpec((B, Cin_p, L), lambda g: (g, 0, 0)),           # activations
                pl.BlockSpec((2 * Cout, K * K * Cin_p), lambda g: (0, 0)),  # fused weights
                pl.BlockSpec((Cout, 1), lambda g: (0, 0)),                  # conv bias
                pl.BlockSpec((Cout, 1), lambda g: (0, 0)),                  # shortcut bias
            ],
            out_specs=pl.BlockSpec((B, Cout, S), lambda g: (g, 0, 0)),
            scratch_shapes=[pltpu.VMEM((K * K * Cin_p, B * S), compute_dtype)],
        ),
        compiler_params=pltpu.CompilerParams(
            dimension_semantics=("parallel",),   # only matters when grid_steps>1 (v7x)
            vmem_limit_bytes=32 * 1024 * 1024),
    )(x_flat, w_all, bc, bs)

    # Output is already NCHW-ordered (N, Cout, H*W): free reshape, no transpose.
    return out.reshape(N, Cout, H, W)


def _reference_forward(x_nchw, w_conv, b_conv, w_sc, b_sc):
    """Pure-JAX (f32) reference matching the PyTorch module semantics."""
    x = jnp.transpose(x_nchw, (0, 2, 3, 1))  # NHWC
    dn = jax.lax.conv_dimension_numbers(x.shape, w_conv.shape,
                                        ("NHWC", "HWIO", "NHWC"))
    conv = jax.lax.conv_general_dilated(x, w_conv, window_strides=(1, 1),
                                        padding="SAME",
                                        dimension_numbers=dn) + b_conv
    conv = jnp.maximum(conv, 0.0)
    sc = jnp.einsum("nhwc,co->nhwo", x, w_sc) + b_sc
    out = conv + sc
    return jnp.transpose(out, (0, 3, 1, 2))


if __name__ == "__main__":
    # Module config: in_channels=4, out_channels=8, kernel_size=3,
    # stride=1, padding='same'  => shortcut projection exists (4 != 8).
    N, Cin, Cout, H, W, K = 2, 4, 8, 16, 16, 3

    key = jax.random.PRNGKey(0)
    k_x, k_w, k_b, k_ws, k_bs = jax.random.split(key, 5)

    x = jax.random.normal(k_x, (N, Cin, H, W), dtype=jnp.float32)
    # Deterministic synthetic parameters (not a checkpoint load).
    w_conv = 0.1 * jax.random.normal(k_w, (K, K, Cin, Cout), dtype=jnp.float32)
    b_conv = 0.1 * jax.random.normal(k_b, (Cout,), dtype=jnp.float32)
    w_sc = 0.1 * jax.random.normal(k_ws, (Cin, Cout), dtype=jnp.float32)
    b_sc = 0.1 * jax.random.normal(k_bs, (Cout,), dtype=jnp.float32)

    # One-time weight relayout, hoisted out of the per-forward path.
    w_all, bc, bs = jax.block_until_ready(
        prepare_conv_node_params(w_conv, b_conv, w_sc, b_sc))

    # grid_steps=1: whole batch in a single grid step (best on single-TC
    # v5e/v6e).  On dual-TC v7x, pass grid_steps=2 to shard the batch.
    out = conv_node_forward(x, w_all, bc, bs, K=K, grid_steps=1)
    out = jax.block_until_ready(out)

    ref = jax.block_until_ready(_reference_forward(x, w_conv, b_conv, w_sc, b_sc))
    assert out.shape == (N, Cout, H, W), out.shape
    # bf16 MXU inputs, f32 accumulate/epilogue -> loosened tolerance vs f32 ref.
    np.testing.assert_allclose(np.asarray(out), np.asarray(ref),
                               rtol=3e-2, atol=3e-2)

    print("KERNEL_OK")
</pallas_src>

<mosaic_0001>
module attributes {stable_mosaic.version = 11 : i64} {
  func.func @_fused_conv_relu_residual_kernel(%arg0: i32, %arg1: memref<2x16x290xbf16, #tpu.memory_space<vmem>>, %arg2: memref<16x144xbf16, #tpu.memory_space<vmem>>, %arg3: memref<8x1xf32, #tpu.memory_space<vmem>>, %arg4: memref<8x1xf32, #tpu.memory_space<vmem>>, %arg5: memref<2x8x256xf32, #tpu.memory_space<vmem>>, %arg6: memref<144x512xbf16, #tpu.memory_space<vmem>>) attributes {dimension_semantics = [#tpu.dimension_semantics<parallel>], iteration_bounds = array<i64: 1>, scalar_prefetch = 0 : i64, scratch_operands = 1 : i64, tpu.core_type = #tpu.core_type<tc>, window_params = [{transform_indices = @transform_0, window_bounds = array<i64: 2, 16, 290>}, {pipeline_mode = #tpu.pipeline_mode<synchronous>, transform_indices = @transform_1, window_bounds = array<i64: 16, 144>}, {pipeline_mode = #tpu.pipeline_mode<synchronous>, transform_indices = @transform_2, window_bounds = array<i64: 8, 1>}, {pipeline_mode = #tpu.pipeline_mode<synchronous>, transform_indices = @transform_3, window_bounds = array<i64: 8, 1>}, {transform_indices = @transform_4, window_bounds = array<i64: 2, 8, 256>}]} {
    %0 = tpu.iota {dimensions = array<i32: 1>} : vector<1x256xi32>
    %c16_i32 = arith.constant 16 : i32
    %c0_i32 = arith.constant 0 : i32
    %1 = arith.cmpi eq, %c16_i32, %c0_i32 : i32
    %c1_i32 = arith.constant 1 : i32
    %2 = arith.select %1, %c1_i32, %c16_i32 : i32
    %3 = vector.broadcast %2 : i32 to vector<1x256xi32>
    %4 = arith.remsi %0, %3 : vector<1x256xi32>
    %c0_i32_0 = arith.constant 0 : i32
    %5 = vector.broadcast %c0_i32_0 : i32 to vector<1x256xi32>
    %6 = arith.cmpi ne, %4, %5 : vector<1x256xi32>
    %c0_i32_1 = arith.constant 0 : i32
    %7 = vector.broadcast %c0_i32_1 : i32 to vector<1x256xi32>
    %8 = arith.cmpi slt, %4, %7 : vector<1x256xi32>
    %c0_i32_2 = arith.constant 0 : i32
    %9 = arith.cmpi slt, %2, %c0_i32_2 : i32
    %10 = vector.broadcast %9 : i1 to vector<1x256xi1>
    %11 = vector.broadcast %10 : vector<1x256xi1> to vector<1x256xi1>
    %12 = arith.xori %8, %11 : vector<1x256xi1>
    %13 = arith.andi %12, %6 : vector<1x256xi1>
    %14 = vector.broadcast %2 : i32 to vector<1x256xi32>
    %15 = arith.addi %4, %14 : vector<1x256xi32>
    %16 = arith.select %13, %15, %4 : vector<1x256xi1>, vector<1x256xi32>
    %c-1_i32 = arith.constant -1 : i32
    %17 = vector.broadcast %c-1_i32 : i32 to vector<1x256xi32>
    %18 = arith.addi %16, %17 : vector<1x256xi32>
    %c0_i32_3 = arith.constant 0 : i32
    %19 = vector.broadcast %c0_i32_3 : i32 to vector<1x256xi32>
    %20 = arith.cmpi sge, %18, %19 : vector<1x256xi32>
    %c-1_i32_4 = arith.constant -1 : i32
    %21 = vector.broadcast %c-1_i32_4 : i32 to vector<1x256xi32>
    %22 = arith.addi %16, %21 : vector<1x256xi32>
    %c16_i32_5 = arith.constant 16 : i32
    %23 = vector.broadcast %c16_i32_5 : i32 to vector<1x256xi32>
    %24 = arith.cmpi slt, %22, %23 : vector<1x256xi32>
    %25 = arith.andi %20, %24 : vector<1x256xi1>
    %26 = vector.shape_cast %25 : vector<1x256xi1> to vector<1x256xi1>
    %27 = vector.broadcast %26 : vector<1x256xi1> to vector<16x256xi1>
    %c1_i32_6 = arith.constant 1 : i32
    %28 = vector.broadcast %c1_i32_6 : i32 to vector<1x256xi32>
    %29 = arith.addi %16, %28 : vector<1x256xi32>
    %c0_i32_7 = arith.constant 0 : i32
    %30 = vector.broadcast %c0_i32_7 : i32 to vector<1x256xi32>
    %31 = arith.cmpi sge, %29, %30 : vector<1x256xi32>
    %c1_i32_8 = arith.constant 1 : i32
    %32 = vector.broadcast %c1_i32_8 : i32 to vector<1x256xi32>
    %33 = arith.addi %16, %32 : vector<1x256xi32>
    %c16_i32_9 = arith.constant 16 : i32
    %34 = vector.broadcast %c16_i32_9 : i32 to vector<1x256xi32>
    %35 = arith.cmpi slt, %33, %34 : vector<1x256xi32>
    %36 = arith.andi %31, %35 : vector<1x256xi1>
    %37 = vector.shape_cast %36 : vector<1x256xi1> to vector<1x256xi1>
    %38 = vector.broadcast %37 : vector<1x256xi1> to vector<16x256xi1>
    %c0 = arith.constant 0 : index
    %c0_10 = arith.constant 0 : index
    %c0_11 = arith.constant 0 : index
    %39 = vector.load %arg1[%c0, %c0_10, %c0_11] : memref<2x16x290xbf16, #tpu.memory_space<vmem>>, vector<1x16x256xbf16>
    %40 = vector.shape_cast %39 : vector<1x16x256xbf16> to vector<16x256xbf16>
    %cst = arith.constant 0.000000e+00 : bf16
    %41 = vector.broadcast %cst : bf16 to vector<16x256xbf16>
    %42 = arith.select %27, %40, %41 : vector<16x256xi1>, vector<16x256xbf16>
    %c0_12 = arith.constant 0 : index
    %c0_13 = arith.constant 0 : index
    %43 = vector.load %arg6[%c0_12, %c0_13] : memref<144x512xbf16, #tpu.memory_space<vmem>>, vector<16x256xbf16>
    tpu.vector_store %arg6[%c0_12, %c0_13], %42 {strides = array<i32>} : memref<144x512xbf16, #tpu.memory_space<vmem>>, vector<16x256xbf16>,
    %c0_14 = arith.constant 0 : index
    %c0_15 = arith.constant 0 : index
    %c1 = arith.constant 1 : index
    %44 = vector.load %arg1[%c0_14, %c0_15, %c1] : memref<2x16x290xbf16, #tpu.memory_space<vmem>>, vector<1x16x256xbf16>
    %45 = vector.shape_cast %44 : vector<1x16x256xbf16> to vector<16x256xbf16>
    %c16 = arith.constant 16 : index
    %c0_16 = arith.constant 0 : index
    %46 = vector.load %arg6[%c16, %c0_16] : memref<144x512xbf16, #tpu.memory_space<vmem>>, vector<16x256xbf16>
    tpu.vector_store %arg6[%c16, %c0_16], %45 {strides = array<i32>} : memref<144x512xbf16, #tpu.memory_space<vmem>>, vector<16x256xbf16>,
    %c0_17 = arith.constant 0 : index
    %c0_18 = arith.constant 0 : index
    %c2 = arith.constant 2 : index
    %47 = vector.load %arg1[%c0_17, %c0_18, %c2] : memref<2x16x290xbf16, #tpu.memory_space<vmem>>, vector<1x16x256xbf16>
    %48 = vector.shape_cast %47 : vector<1x16x256xbf16> to vector<16x256xbf16>
    %cst_19 = arith.constant 0.000000e+00 : bf16
    %49 = vector.broadcast %cst_19 : bf16 to vector<16x256xbf16>
    %50 = arith.select %38, %48, %49 : vector<16x256xi1>, vector<16x256xbf16>
    %c32 = arith.constant 32 : index
    %c0_20 = arith.constant 0 : index
    %51 = vector.load %arg6[%c32, %c0_20] : memref<144x512xbf16, #tpu.memory_space<vmem>>, vector<16x256xbf16>
    tpu.vector_store %arg6[%c32, %c0_20], %50 {strides = array<i32>} : memref<144x512xbf16, #tpu.memory_space<vmem>>, vector<16x256xbf16>,
    %c0_21 = arith.constant 0 : index
    %c0_22 = arith.constant 0 : index
    %c16_23 = arith.constant 16 : index
    %52 = vector.load %arg1[%c0_21, %c0_22, %c16_23] : memref<2x16x290xbf16, #tpu.memory_space<vmem>>, vector<1x16x256xbf16>
    %53 = vector.shape_cast %52 : vector<1x16x256xbf16> to vector<16x256xbf16>
    %cst_24 = arith.constant 0.000000e+00 : bf16
    %54 = vector.broadcast %cst_24 : bf16 to vector<16x256xbf16>
    %55 = arith.select %27, %53, %54 : vector<16x256xi1>, vector<16x256xbf16>
    %c48 = arith.constant 48 : index
    %c0_25 = arith.constant 0 : index
    %56 = vector.load %arg6[%c48, %c0_25] : memref<144x512xbf16, #tpu.memory_space<vmem>>, vector<16x256xbf16>
    tpu.vector_store %arg6[%c48, %c0_25], %55 {strides = array<i32>} : memref<144x512xbf16, #tpu.memory_space<vmem>>, vector<16x256xbf16>,
    %c0_26 = arith.constant 0 : index
    %c0_27 = arith.constant 0 : index
    %c17 = arith.constant 17 : index
    %57 = vector.load %arg1[%c0_26, %c0_27, %c17] : memref<2x16x290xbf16, #tpu.memory_space<vmem>>, vector<1x16x256xbf16>
    %58 = vector.shape_cast %57 : vector<1x16x256xbf16> to vector<16x256xbf16>
    %c64 = arith.constant 64 : index
    %c0_28 = arith.constant 0 : index
    %59 = vector.load %arg6[%c64, %c0_28] : memref<144x512xbf16, #tpu.memory_space<vmem>>, vector<16x256xbf16>
    tpu.vector_store %arg6[%c64, %c0_28], %58 {strides = array<i32>} : memref<144x512xbf16, #tpu.memory_space<vmem>>, vector<16x256xbf16>,
    %c0_29 = arith.constant 0 : index
    %c0_30 = arith.constant 0 : index
    %c18 = arith.constant 18 : index
    %60 = vector.load %arg1[%c0_29, %c0_30, %c18] : memref<2x16x290xbf16, #tpu.memory_space<vmem>>, vector<1x16x256xbf16>
    %61 = vector.shape_cast %60 : vector<1x16x256xbf16> to vector<16x256xbf16>
    %cst_31 = arith.constant 0.000000e+00 : bf16
    %62 = vector.broadcast %cst_31 : bf16 to vector<16x256xbf16>
    %63 = arith.select %38, %61, %62 : vector<16x256xi1>, vector<16x256xbf16>
    %c80 = arith.constant 80 : index
    %c0_32 = arith.constant 0 : index
    %64 = vector.load %arg6[%c80, %c0_32] : memref<144x512xbf16, #tpu.memory_space<vmem>>, vector<16x256xbf16>
    tpu.vector_store %arg6[%c80, %c0_32], %63 {strides = array<i32>} : memref<144x512xbf16, #tpu.memory_space<vmem>>, vector<16x256xbf16>,
    %c0_33 = arith.constant 0 : index
    %c0_34 = arith.constant 0 : index
    %c32_35 = arith.constant 32 : index
    %65 = vector.load %arg1[%c0_33, %c0_34, %c32_35] : memref<2x16x290xbf16, #tpu.memory_space<vmem>>, vector<1x16x256xbf16>
    %66 = vector.shape_cast %65 : vector<1x16x256xbf16> to vector<16x256xbf16>
    %cst_36 = arith.constant 0.000000e+00 : bf16
    %67 = vector.broadcast %cst_36 : bf16 to vector<16x256xbf16>
    %68 = arith.select %27, %66, %67 : vector<16x256xi1>, vector<16x256xbf16>
    %c96 = arith.constant 96 : index
    %c0_37 = arith.constant 0 : index
    %69 = vector.load %arg6[%c96, %c0_37] : memref<144x512xbf16, #tpu.memory_space<vmem>>, vector<16x256xbf16>
    tpu.vector_store %arg6[%c96, %c0_37], %68 {strides = array<i32>} : memref<144x512xbf16, #tpu.memory_space<vmem>>, vector<16x256xbf16>,
    %c0_38 = arith.constant 0 : index
    %c0_39 = arith.constant 0 : index
    %c33 = arith.constant 33 : index
    %70 = vector.load %arg1[%c0_38, %c0_39, %c33] : memref<2x16x290xbf16, #tpu.memory_space<vmem>>, vector<1x16x256xbf16>
    %71 = vector.shape_cast %70 : vector<1x16x256xbf16> to vector<16x256xbf16>
    %c112 = arith.constant 112 : index
    %c0_40 = arith.constant 0 : index
    %72 = vector.load %arg6[%c112, %c0_40] : memref<144x512xbf16, #tpu.memory_space<vmem>>, vector<16x256xbf16>
    tpu.vector_store %arg6[%c112, %c0_40], %71 {strides = array<i32>} : memref<144x512xbf16, #tpu.memory_space<vmem>>, vector<16x256xbf16>,
    %c0_41 = arith.constant 0 : index
    %c0_42 = arith.constant 0 : index
    %c34 = arith.constant 34 : index
    %73 = vector.load %arg1[%c0_41, %c0_42, %c34] : memref<2x16x290xbf16, #tpu.memory_space<vmem>>, vector<1x16x256xbf16>
    %74 = vector.shape_cast %73 : vector<1x16x256xbf16> to vector<16x256xbf16>
    %cst_43 = arith.constant 0.000000e+00 : bf16
    %75 = vector.broadcast %cst_43 : bf16 to vector<16x256xbf16>
    %76 = arith.select %38, %74, %75 : vector<16x256xi1>, vector<16x256xbf16>
    %c128 = arith.constant 128 : index
    %c0_44 = arith.constant 0 : index
    %77 = vector.load %arg6[%c128, %c0_44] : memref<144x512xbf16, #tpu.memory_space<vmem>>, vector<16x256xbf16>
    tpu.vector_store %arg6[%c128, %c0_44], %76 {strides = array<i32>} : memref<144x512xbf16, #tpu.memory_space<vmem>>, vector<16x256xbf16>,
    %c1_45 = arith.constant 1 : index
    %c0_46 = arith.constant 0 : index
    %c0_47 = arith.constant 0 : index
    %78 = vector.load %arg1[%c1_45, %c0_46, %c0_47] : memref<2x16x290xbf16, #tpu.memory_space<vmem>>, vector<1x16x256xbf16>
    %79 = vector.shape_cast %78 : vector<1x16x256xbf16> to vector<16x256xbf16>
    %cst_48 = arith.constant 0.000000e+00 : bf16
    %80 = vector.broadcast %cst_48 : bf16 to vector<16x256xbf16>
    %81 = arith.select %27, %79, %80 : vector<16x256xi1>, vector<16x256xbf16>
    %c0_49 = arith.constant 0 : index
    %c256 = arith.constant 256 : index
    %82 = vector.load %arg6[%c0_49, %c256] : memref<144x512xbf16, #tpu.memory_space<vmem>>, vector<16x256xbf16>
    tpu.vector_store %arg6[%c0_49, %c256], %81 {strides = array<i32>} : memref<144x512xbf16, #tpu.memory_space<vmem>>, vector<16x256xbf16>,
    %c1_50 = arith.constant 1 : index
    %c0_51 = arith.constant 0 : index
    %c1_52 = arith.constant 1 : index
    %83 = vector.load %arg1[%c1_50, %c0_51, %c1_52] : memref<2x16x290xbf16, #tpu.memory_space<vmem>>, vector<1x16x256xbf16>
    %84 = vector.shape_cast %83 : vector<1x16x256xbf16> to vector<16x256xbf16>
    %c16_53 = arith.constant 16 : index
    %c256_54 = arith.constant 256 : index
    %85 = vector.load %arg6[%c16_53, %c256_54] : memref<144x512xbf16, #tpu.memory_space<vmem>>, vector<16x256xbf16>
    tpu.vector_store %arg6[%c16_53, %c256_54], %84 {strides = array<i32>} : memref<144x512xbf16, #tpu.memory_space<vmem>>, vector<16x256xbf16>,
    %c1_55 = arith.constant 1 : index
    %c0_56 = arith.constant 0 : index
    %c2_57 = arith.constant 2 : index
    %86 = vector.load %arg1[%c1_55, %c0_56, %c2_57] : memref<2x16x290xbf16, #tpu.memory_space<vmem>>, vector<1x16x256xbf16>
    %87 = vector.shape_cast %86 : vector<1x16x256xbf16> to vector<16x256xbf16>
    %cst_58 = arith.constant 0.000000e+00 : bf16
    %88 = vector.broadcast %cst_58 : bf16 to vector<16x256xbf16>
    %89 = arith.select %38, %87, %88 : vector<16x256xi1>, vector<16x256xbf16>
    %c32_59 = arith.constant 32 : index
    %c256_60 = arith.constant 256 : index
    %90 = vector.load %arg6[%c32_59, %c256_60] : memref<144x512xbf16, #tpu.memory_space<vmem>>, vector<16x256xbf16>
    tpu.vector_store %arg6[%c32_59, %c256_60], %89 {strides = array<i32>} : memref<144x512xbf16, #tpu.memory_space<vmem>>, vector<16x256xbf16>,
    %c1_61 = arith.constant 1 : index
    %c0_62 = arith.constant 0 : index
    %c16_63 = arith.constant 16 : index
    %91 = vector.load %arg1[%c1_61, %c0_62, %c16_63] : memref<2x16x290xbf16, #tpu.memory_space<vmem>>, vector<1x16x256xbf16>
    %92 = vector.shape_cast %91 : vector<1x16x256xbf16> to vector<16x256xbf16>
    %cst_64 = arith.constant 0.000000e+00 : bf16
    %93 = vector.broadcast %cst_64 : bf16 to vector<16x256xbf16>
    %94 = arith.select %27, %92, %93 : vector<16x256xi1>, vector<16x256xbf16>
    %c48_65 = arith.constant 48 : index
    %c256_66 = arith.constant 256 : index
    %95 = vector.load %arg6[%c48_65, %c256_66] : memref<144x512xbf16, #tpu.memory_space<vmem>>, vector<16x256xbf16>
    tpu.vector_store %arg6[%c48_65, %c256_66], %94 {strides = array<i32>} : memref<144x512xbf16, #tpu.memory_space<vmem>>, vector<16x256xbf16>,
    %c1_67 = arith.constant 1 : index
    %c0_68 = arith.constant 0 : index
    %c17_69 = arith.constant 17 : index
    %96 = vector.load %arg1[%c1_67, %c0_68, %c17_69] : memref<2x16x290xbf16, #tpu.memory_space<vmem>>, vector<1x16x256xbf16>
    %97 = vector.shape_cast %96 : vector<1x16x256xbf16> to vector<16x256xbf16>
    %c64_70 = arith.constant 64 : index
    %c256_71 = arith.constant 256 : index
    %98 = vector.load %arg6[%c64_70, %c256_71] : memref<144x512xbf16, #tpu.memory_space<vmem>>, vector<16x256xbf16>
    tpu.vector_store %arg6[%c64_70, %c256_71], %97 {strides = array<i32>} : memref<144x512xbf16, #tpu.memory_space<vmem>>, vector<16x256xbf16>,
    %c1_72 = arith.constant 1 : index
    %c0_73 = arith.constant 0 : index
    %c18_74 = arith.constant 18 : index
    %99 = vector.load %arg1[%c1_72, %c0_73, %c18_74] : memref<2x16x290xbf16, #tpu.memory_space<vmem>>, vector<1x16x256xbf16>
    %100 = vector.shape_cast %99 : vector<1x16x256xbf16> to vector<16x256xbf16>
    %cst_75 = arith.constant 0.000000e+00 : bf16
    %101 = vector.broadcast %cst_75 : bf16 to vector<16x256xbf16>
    %102 = arith.select %38, %100, %101 : vector<16x256xi1>, vector<16x256xbf16>
    %c80_76 = arith.constant 80 : index
    %c256_77 = arith.constant 256 : index
    %103 = vector.load %arg6[%c80_76, %c256_77] : memref<144x512xbf16, #tpu.memory_space<vmem>>, vector<16x256xbf16>
    tpu.vector_store %arg6[%c80_76, %c256_77], %102 {strides = array<i32>} : memref<144x512xbf16, #tpu.memory_space<vmem>>, vector<16x256xbf16>,
    %c1_78 = arith.constant 1 : index
    %c0_79 = arith.constant 0 : index
    %c32_80 = arith.constant 32 : index
    %104 = vector.load %arg1[%c1_78, %c0_79, %c32_80] : memref<2x16x290xbf16, #tpu.memory_space<vmem>>, vector<1x16x256xbf16>
    %105 = vector.shape_cast %104 : vector<1x16x256xbf16> to vector<16x256xbf16>
    %cst_81 = arith.constant 0.000000e+00 : bf16
    %106 = vector.broadcast %cst_81 : bf16 to vector<16x256xbf16>
    %107 = arith.select %27, %105, %106 : vector<16x256xi1>, vector<16x256xbf16>
    %c96_82 = arith.constant 96 : index
    %c256_83 = arith.constant 256 : index
    %108 = vector.load %arg6[%c96_82, %c256_83] : memref<144x512xbf16, #tpu.memory_space<vmem>>, vector<16x256xbf16>
    tpu.vector_store %arg6[%c96_82, %c256_83], %107 {strides = array<i32>} : memref<144x512xbf16, #tpu.memory_space<vmem>>, vector<16x256xbf16>,
    %c1_84 = arith.constant 1 : index
    %c0_85 = arith.constant 0 : index
    %c33_86 = arith.constant 33 : index
    %109 = vector.load %arg1[%c1_84, %c0_85, %c33_86] : memref<2x16x290xbf16, #tpu.memory_space<vmem>>, vector<1x16x256xbf16>
    %110 = vector.shape_cast %109 : vector<1x16x256xbf16> to vector<16x256xbf16>
    %c112_87 = arith.constant 112 : index
    %c256_88 = arith.constant 256 : index
    %111 = vector.load %arg6[%c112_87, %c256_88] : memref<144x512xbf16, #tpu.memory_space<vmem>>, vector<16x256xbf16>
    tpu.vector_store %arg6[%c112_87, %c256_88], %110 {strides = array<i32>} : memref<144x512xbf16, #tpu.memory_space<vmem>>, vector<16x256xbf16>,
    %c1_89 = arith.constant 1 : index
    %c0_90 = arith.constant 0 : index
    %c34_91 = arith.constant 34 : index
    %112 = vector.load %arg1[%c1_89, %c0_90, %c34_91] : memref<2x16x290xbf16, #tpu.memory_space<vmem>>, vector<1x16x256xbf16>
    %113 = vector.shape_cast %112 : vector<1x16x256xbf16> to vector<16x256xbf16>
    %cst_92 = arith.constant 0.000000e+00 : bf16
    %114 = vector.broadcast %cst_92 : bf16 to vector<16x256xbf16>
    %115 = arith.select %38, %113, %114 : vector<16x256xi1>, vector<16x256xbf16>
    %c128_93 = arith.constant 128 : index
    %c256_94 = arith.constant 256 : index
    %116 = vector.load %arg6[%c128_93, %c256_94] : memref<144x512xbf16, #tpu.memory_space<vmem>>, vector<16x256xbf16>
    tpu.vector_store %arg6[%c128_93, %c256_94], %115 {strides = array<i32>} : memref<144x512xbf16, #tpu.memory_space<vmem>>, vector<16x256xbf16>,
    %c0_95 = arith.constant 0 : index
    %c0_96 = arith.constant 0 : index
    %117 = vector.load %arg2[%c0_95, %c0_96] : memref<16x144xbf16, #tpu.memory_space<vmem>>, vector<16x144xbf16>
    %c0_97 = arith.constant 0 : index
    %c0_98 = arith.constant 0 : index
    %118 = vector.load %arg6[%c0_97, %c0_98] : memref<144x512xbf16, #tpu.memory_space<vmem>>, vector<144x512xbf16>
    %cst_99 = arith.constant dense<0.000000e+00> : vector<16x512xf32>
    %119 = tpu.matmul %117, %118, %cst_99 {dimension_numbers = #tpu.dot_dimension_numbers<[1], [0], [0], [1], [0, 0, 1, 1], [], []>} : vector<16x144xbf16>, vector<144x512xbf16>, vector<16x512xf32> -> vector<16x512xf32>
    %120 = vector.extract_strided_slice %119 {offsets = [0, 0], sizes = [8, 512], strides = [1, 1]} : vector<16x512xf32> to vector<8x512xf32>
    %c0_100 = arith.constant 0 : index
    %c0_101 = arith.constant 0 : index
    %121 = vector.load %arg3[%c0_100, %c0_101] : memref<8x1xf32, #tpu.memory_space<vmem>>, vector<8x1xf32>
    %122 = vector.broadcast %121 : vector<8x1xf32> to vector<8x512xf32>
    %123 = arith.addf %120, %122 : vector<8x512xf32>
    %cst_102 = arith.constant 0.000000e+00 : f32
    %124 = vector.broadcast %cst_102 : f32 to vector<8x512xf32>
    %125 = arith.maximumf %123, %124 : vector<8x512xf32>
    %126 = vector.extract_strided_slice %119 {offsets = [8, 0], sizes = [8, 512], strides = [1, 1]} : vector<16x512xf32> to vector<8x512xf32>
    %127 = arith.addf %125, %126 : vector<8x512xf32>
    %c0_103 = arith.constant 0 : index
    %c0_104 = arith.constant 0 : index
    %128 = vector.load %arg4[%c0_103, %c0_104] : memref<8x1xf32, #tpu.memory_space<vmem>>, vector<8x1xf32>
    %129 = vector.broadcast %128 : vector<8x1xf32> to vector<8x512xf32>
    %130 = arith.addf %127, %129 : vector<8x512xf32>
    %131 = vector.extract_strided_slice %130 {offsets = [0, 0], sizes = [8, 256], strides = [1, 1]} : vector<8x512xf32> to vector<8x256xf32>
    %c0_105 = arith.constant 0 : index
    %c0_106 = arith.constant 0 : index
    %c0_107 = arith.constant 0 : index
    %132 = vector.load %arg5[%c0_105, %c0_106, %c0_107] : memref<2x8x256xf32, #tpu.memory_space<vmem>>, vector<1x8x256xf32>
    %133 = vector.shape_cast %132 : vector<1x8x256xf32> to vector<8x256xf32>
    %134 = vector.shape_cast %131 : vector<8x256xf32> to vector<1x8x256xf32>
    tpu.vector_store %arg5[%c0_105, %c0_106, %c0_107], %134 {strides = array<i32>} : memref<2x8x256xf32, #tpu.memory_space<vmem>>, vector<1x8x256xf32>,
    %135 = vector.extract_strided_slice %130 {offsets = [0, 256], sizes = [8, 256], strides = [1, 1]} : vector<8x512xf32> to vector<8x256xf32>
    %c1_108 = arith.constant 1 : index
    %c0_109 = arith.constant 0 : index
    %c0_110 = arith.constant 0 : index
    %136 = vector.load %arg5[%c1_108, %c0_109, %c0_110] : memref<2x8x256xf32, #tpu.memory_space<vmem>>, vector<1x8x256xf32>
    %137 = vector.shape_cast %136 : vector<1x8x256xf32> to vector<8x256xf32>
    %138 = vector.shape_cast %135 : vector<8x256xf32> to vector<1x8x256xf32>
    tpu.vector_store %arg5[%c1_108, %c0_109, %c0_110], %138 {strides = array<i32>} : memref<2x8x256xf32, #tpu.memory_space<vmem>>, vector<1x8x256xf32>,
    return
  }
  func.func @transform_0(%arg0: i32) -> (i32, i32, i32) {
    %c0_i32 = arith.constant 0 : i32
    %c0_i32_0 = arith.constant 0 : i32
    %c0_i32_1 = arith.constant 0 : i32
    return %arg0, %c0_i32, %c0_i32_0 : i32, i32, i32
  }
  func.func @transform_1(%arg0: i32) -> (i32, i32) {
    %c0_i32 = arith.constant 0 : i32
    %c0_i32_0 = arith.constant 0 : i32
    %c0_i32_1 = arith.constant 0 : i32
    return %c0_i32, %c0_i32_0 : i32, i32
  }
  func.func @transform_2(%arg0: i32) -> (i32, i32) {
    %c0_i32 = arith.constant 0 : i32
    %c0_i32_0 = arith.constant 0 : i32
    %c0_i32_1 = arith.constant 0 : i32
    return %c0_i32, %c0_i32_0 : i32, i32
  }
  func.func @transform_3(%arg0: i32) -> (i32, i32) {
    %c0_i32 = arith.constant 0 : i32
    %c0_i32_0 = arith.constant 0 : i32
    %c0_i32_1 = arith.constant 0 : i32
    return %c0_i32, %c0_i32_0 : i32, i32
  }
  func.func @transform_4(%arg0: i32) -> (i32, i32, i32) {
    %c0_i32 = arith.constant 0 : i32
    %c0_i32_0 = arith.constant 0 : i32
    %c0_i32_1 = arith.constant 0 : i32
    return %arg0, %c0_i32, %c0_i32_0 : i32, i32, i32
  }
}

</mosaic_0001>

<bundles_post_ra>
// kernel: conv_node_forward.1
= control target key start
LH: loop header
LB: loop body
LE: loop exit
PB: predicated region body
PF: predicated region fallthrough
CT: control target
= control target key end

     0   :  { %v20_v0 = vlaneseq  ;;  %v1069_v3 = vmov 0   ;;  %s1070_s19 = smov 95   ;;  %s1071_s22 = smov 32   ;;  %vm267_vm6 = vcmask 261120   ;;  %vm98_vm9 = vcmask 1043456   ;;  %s1545_s0 = inlined_call_operand.vmem [shape: bf16[2,16,290], index: 0, kind: input, shape index: {}]   ;;  %s1546_s1 = inlined_call_operand.vmem [shape: bf16[16,144], index: 1, kind: input, shape index: {}]   ;;  %s1547_s3 = inlined_call_operand.vmem [shape: f32[8,1], index: 3, kind: input, shape index: {}]   ;;  %s1548_s2 = inlined_call_operand.vmem [shape: f32[8,1], index: 2, kind: input, shape index: {}]   ;;  %s1549_s4 = inlined_call_operand.vmem [shape: f32[2,8,256], index: 4, kind: output, shape index: {}]  }
   0x1   :  { %v301_v1 = vld [vmem:[%s1545_s0 + $0x8] sm:$0xf]  ;;  %v1114_v2 = vld [vmem:[%s1545_s0] sm:$0xff]  ;;  %1064 = vset.pattern.permute.xlu1 %v1069_v3  ;;  %1065 = vset.pattern.permute.xlu0 %v1069_v3  ;;  %v1122_v5 = vld [vmem:[%s1545_s0 + $0xc] sm:$0xff]  ;;  %s1072_s23 = smov 16   ;;  %s1073_s24 = smov 18  }
   0x2   :  { %310 = vrot.lane.b32.xlu0 %v301_v1, %s1070_s19  ;;  %308 = vrot.lane.b32.xlu1 %v1114_v2, %s1070_s19  ;;  %v21_v4 = vand.u32 127, %v20_v0  ;;  %s1074_s25 = smov 2   ;;  %v1135_v16 = vld [vmem:[%s1545_s0 + $0x18] sm:$0xff]  ;;  %s1075_s28 = smov 34   ;;  %v303_v17 = vld [vmem:[%s1545_s0 + $0x14] sm:$0xf] }
   0x3   :  { %v1145_v18 = vld [vmem:[%s1545_s0 + $0x24] sm:$0xff]  ;;  %v1001_v19 = vld [vmem:[%s1545_s0 + $0x20] sm:$0xf]  ;;  %s1076_s9 = smov 111   ;;  %v1003_v20 = vld [vmem:[%s1545_s0 + $0x2c] sm:$0xf] }
   0x4   :  { %v22_v6 = vadd.s32 128, %v21_v4  ;;  %v27_v7 = vand.u32 15, %v21_v4  ;;  %v192_v21 = vld [vmem:[%s1545_s0 + $0x8] sm:$0xf]  ;;  %v194_v22 = vld [vmem:[%s1545_s0 + $0x14] sm:$0xf] }
   0x5   :  { %v989_v23 = vld [vmem:[%s1545_s0 + $0x20] sm:$0xf]  ;;  %s1077_s18 = smov 127   ;;  %v991_v24 = vld [vmem:[%s1545_s0 + $0x2c] sm:$0xf]  ;;  %s1078_s5 = smov 96  }
   0x6   :  { %v34_v8 = vand.u32 15, %v22_v6  ;;  %v47_v9 = vadd.s32 4294967295, %v27_v7  ;;  %v59_v10 = vadd.s32 1, %v27_v7  ;;  %312 = vrot.lane.b32.xlu1 %v1122_v5, %s1070_s19  ;;  %v79_v25 = vld [vmem:[%s1545_s0 + $0x8] sm:$0xf]  ;;  %vm227_vm10 = vcmask 146432  }
   0x7   :  { %v81_v26 = vld [vmem:[%s1545_s0 + $0x14] sm:$0xf]  ;;  %v977_v27 = vld [vmem:[%s1545_s0 + $0x20] sm:$0xf]  ;;  %v979_v28 = vld [vmem:[%s1545_s0 + $0x2c] sm:$0xf] }
   0x8   :  { %v48_v11 = vadd.s32 4294967295, %v34_v8  ;;  %vm49_vm0 = vcmp.ge.s32.totalorder %v47_v9, 0  ;;  %v60_v12 = vadd.s32 1, %v34_v8  ;;  %vm63_vm1 = vcmp.lt.s32.totalorder %v59_v10, 16  ;;  %v261_v35 = vld [vmem:[%s1545_s0 + $0x8] sm:$0xf] }
   0x9   :  { %v263_v42 = vld [vmem:[%s1545_s0 + $0x14] sm:$0xf]  ;;  %v997_v49 = vld [vmem:[%s1545_s0 + $0x20] sm:$0xf]  ;;  %v999_v57 = vld [vmem:[%s1545_s0 + $0x2c] sm:$0xf] }
   0xa   :  { %vm50_vm2 = vcmp.ge.s32.totalorder %v48_v11, 0  ;;  %vm64_vm3 = vcmp.lt.s32.totalorder %v60_v12, 16  ;;  %vm321_vm11 = vcmask 777216   ;;  %v221_v62 = vld [vmem:[%s1545_s0 + $0x8] sm:$0xf]  ;;  %s1079_s14 = smov 110  }
   0xb   :  { %vm1126_vm4 = vmpackc.low %vm50_vm2, %vm49_vm0  ;;  %vm158_vm14 = vcmask 130048   ;;  %vm117_vm2 = vcmask 15360   ;;  %s1081_s6 = smov 126   ;;  %s1082_s15 = smov 94  }
   0xc   :  { %v154_v14 = vsel %vm1126_vm4, 65537, %v1069_v3  ;;  %vm112_vm5 = vmpackc.low %vm64_vm3, %vm63_vm1  ;;  %vm100_vm1 = vcmask 1039360  }
   0xd   :  { %264 = vrot.lane.b32.xlu0 %v154_v14, %s1071_s22  ;;  %155 = vrot.lane.b32.xlu1 %v154_v14, %s1072_s23  ;;  %v113_v15 = vsel %vm112_vm5, 65537, %v1069_v3  ;;  %s1080_s23 = smov 112  }
  0x11   :  { %224 = vrot.lane.b32.xlu0 %v113_v15, %s1073_s24  ;;  %114 = vrot.lane.b32.xlu1 %v113_v15, %s1074_s25 }
  0x15   :  { %333 = vrot.lane.b32.xlu0 %v113_v15, %s1075_s28  ;;  %568 = vrot.lane.b32.xlu1 %v1135_v16, %s1070_s19 }
  0x19   :  { %314 = vrot.lane.b32.xlu0 %v303_v17, %s1070_s19  ;;  %572 = vrot.lane.b32.xlu1 %v1145_v18, %s1070_s19 }
  0x1d   :  { %570 = vrot.lane.b32.xlu0 %v1001_v19, %s1070_s19  ;;  %199 = vrot.lane.b32.xlu1 %v1114_v2, %s1076_s9 }
  0x21   :  { %574 = vrot.lane.b32.xlu0 %v1003_v20, %s1070_s19  ;;  %203 = vrot.lane.b32.xlu1 %v1122_v5, %s1076_s9  ;;  %v223_v20 = vld [vmem:[%s1545_s0 + $0x14] sm:$0xf] }
  0x25   :  { %201 = vrot.lane.b32.xlu0 %v192_v21, %s1076_s9  ;;  %476 = vrot.lane.b32.xlu1 %v1135_v16, %s1076_s9 }
  0x29   :  { %205 = vrot.lane.b32.xlu0 %v194_v22, %s1076_s9  ;;  %480 = vrot.lane.b32.xlu1 %v1145_v18, %s1076_s9 }
  0x2d   :  { %478 = vrot.lane.b32.xlu0 %v989_v23, %s1076_s9  ;;  %86 = vrot.lane.b32.xlu1 %v1114_v2, %s1077_s18 }
  0x31   :  { %482 = vrot.lane.b32.xlu0 %v991_v24, %s1076_s9  ;;  %90 = vrot.lane.b32.xlu1 %v1122_v5, %s1077_s18 }
  0x35   :  { %88 = vrot.lane.b32.xlu0 %v79_v25, %s1077_s18  ;;  %384 = vrot.lane.b32.xlu1 %v1135_v16, %s1077_s18 }
  0x39   :  { %92 = vrot.lane.b32.xlu0 %v81_v26, %s1077_s18  ;;  %388 = vrot.lane.b32.xlu1 %v1145_v18, %s1077_s18 }
  0x3d   :  { %386 = vrot.lane.b32.xlu0 %v977_v27, %s1077_s18 }
  0x41   :  { %390 = vrot.lane.b32.xlu0 %v979_v28, %s1077_s18 }
  0x74   :  { %v309_v29 = vpop.permute.xlu1 %308  ;;  %v311_v30 = vpop.permute.xlu0 %310 }
  0x75   :  { %v317_v46 = vrot.slane %v311_v30, 4  ;;  %v316_v47 = vrot.slane %v309_v29, 4 }
  0x77   :  { %v320_v58 = vsel %vm98_vm9, %v316_v47, %v317_v46 }
  0x78   :  { %v313_v31 = vpop.permute.xlu1 %312  ;;  %v322_v0 = vsel %vm321_vm11, %v309_v29, %v320_v58  ;;  %v993_v29 = vld [vmem:[%s1545_s0 + $0x20] sm:$0xf] }
  0x79   :  { %v318_v51 = vrot.slane %v313_v31, 4 }
  0x7f   :  { %v265_v32 = vpop.permute.xlu0 %264  ;;  %v1190_v33 = vpop.permute.xlu1 %155 }
  0x80   :  { %v266_v34 = vrot.slane %v265_v32, 4 }
  0x82   :  { %v268_v36 = vsel %vm267_vm6, %v266_v34, %v265_v32  ;;  %vm1195_vm7 = vcmp.ne.s16.totalorder %v266_v34, 0  ;;  %v157_v32 = vrot.slane %v1190_v33, 4  ;;  %vm336_vm6 = vcmask 277504  }
  0x83   :  { %vm269_vm8 = vcmp.ne.s16.totalorder %v268_v36, 0  ;;  %v225_v38 = vpop.permute.xlu0 %224  ;;  %v272_v39 = vsel %vm1195_vm7, %v261_v35, 0  ;;  %v1201_v40 = vpop.permute.xlu1 %114  ;;  %v274_v44 = vsel %vm1195_vm7, %v263_v42, 0  ;;  %v533_v53 = vsel %vm1195_vm7, %v997_v49, 0  ;;  %v151_v42 = vld [vmem:[%s1545_s0 + $0x8] sm:$0xf] }
  0x84   :  { %281 = vrot.lane.b32.xlu0 %v272_v39, %s1078_s5  ;;  %v271_v41 = vsel %vm269_vm8, %v1114_v2, 0  ;;  %v273_v48 = vsel %vm269_vm8, %v1122_v5, 0  ;;  %v226_v50 = vrot.slane %v225_v38, 4  ;;  %v532_v56 = vsel %vm269_vm8, %v1135_v16, 0 }
  0x85   :  { %279 = vrot.lane.b32.xlu1 %v271_v41, %s1078_s5  ;;  %v535_v63 = vsel %vm1195_vm7, %v999_v57, 0  ;;  %v534_v7 = vsel %vm269_vm8, %v1145_v18, 0  ;;  %v159_v39 = vsel %vm158_vm14, %v157_v32, %v1190_v33  ;;  %vm1293_vm15 = vcmp.ne.s16.totalorder %v157_v32, 0  ;;  %v981_v41 = vld [vmem:[%s1545_s0 + $0x20] sm:$0xf] }
  0x86   :  { %v228_v59 = vsel %vm227_vm10, %v226_v50, %v225_v38  ;;  %vm1231_vm12 = vcmp.ne.s16.totalorder %v226_v50, 0  ;;  %v995_v38 = vld [vmem:[%s1545_s0 + $0x2c] sm:$0xf]  ;;  %vm160_vm0 = vcmp.ne.s16.totalorder %v159_v39, 0  ;;  %v163_v33 = vsel %vm1293_vm15, %v151_v42, 0 }
  0x87   :  { %v1210_v43 = vpop.permute.xlu0 %333  ;;  %v569_v45 = vpop.permute.xlu1 %568  ;;  %vm229_vm13 = vcmp.ne.s16.totalorder %v228_v59, 0  ;;  %v232_v11 = vsel %vm1231_vm12, %v221_v62, 0  ;;  %v234_v24 = vsel %vm1231_vm12, %v223_v20, 0  ;;  %v501_v34 = vsel %vm1231_vm12, %v993_v29, 0 }
  0x88   :  { %285 = vrot.lane.b32.xlu0 %v274_v44, %s1078_s5  ;;  %v576_v4 = vrot.slane %v569_v45, 4  ;;  %v231_v19 = vsel %vm229_vm13, %v1114_v2, 0  ;;  %v233_v28 = vsel %vm229_vm13, %v1122_v5, 0  ;;  %v500_v37 = vsel %vm229_vm13, %v1135_v16, 0 }
  0x89   :  { %283 = vrot.lane.b32.xlu1 %v273_v48, %s1078_s5  ;;  %v503_v44 = vsel %vm1231_vm12, %v995_v38, 0  ;;  %v502_v47 = vsel %vm229_vm13, %v1145_v18, 0  ;;  %v162_v50 = vsel %vm160_vm0, %v1114_v2, 0  ;;  %v116_v59 = vrot.slane %v1201_v40, 4 }
  0x8a   :  { %vm292_vm10 = vcmask 785408   ;;  %vm252_vm12 = vcmask 900096   ;;  %vm183_vm13 = vcmask 916480  }
  0x8b   :  { %v315_v52 = vpop.permute.xlu0 %314  ;;  %v573_v54 = vpop.permute.xlu1 %572  ;;  %vm1343_vm3 = vcmp.ne.s16.totalorder %v116_v59, 0 }
  0x8c   :  { %v319_v55 = vrot.slane %v315_v52, 4  ;;  %542 = vrot.lane.b32.xlu0 %v533_v53, %s1078_s5  ;;  %v578_v12 = vrot.slane %v573_v54, 4 }
  0x8d   :  { %540 = vrot.lane.b32.xlu1 %v532_v56, %s1078_s5  ;;  %v985_v56 = vld [vmem:[%s1545_s0 + $0x20] sm:$0xf] }
  0x8e   :  { %v323_v61 = vsel %vm98_vm9, %v318_v51, %v319_v55  ;;  %v153_v51 = vld [vmem:[%s1545_s0 + $0x14] sm:$0xf]  ;;  %v164_v55 = vsel %vm160_vm0, %v1122_v5, 0  ;;  %v441_v62 = vsel %vm1293_vm15, %v985_v56, 0 }
  0x8f   :  { %v324_v1 = vsel %vm321_vm11, %v313_v31, %v323_v61  ;;  %v571_v3 = vpop.permute.xlu0 %570  ;;  %v1243_v6 = vpop.permute.xlu1 %199  ;;  %v165_v53 = vsel %vm1293_vm15, %v153_v51, 0  ;;  %v332_v56 = vld [vmem:[%s1545_s0 + $0x14] sm:$0xf] }
  0x90   :  { %546 = vrot.lane.b32.xlu0 %v535_v63, %s1078_s5  ;;  %v1039_v8 = vcombine.high %v322_v0, %v324_v1  ;;  %v1038_v9 = vcombine.low %v322_v0, %v324_v1  ;;  %v577_v10 = vrot.slane %v571_v3, 4  ;;  %v440_v1 = vsel %vm160_vm0, %v1135_v16, 0  ;;  %v987_v3 = vld [vmem:[%s1545_s0 + $0x2c] sm:$0xf] }
  0x91   :  { %544 = vrot.lane.b32.xlu1 %v534_v7, %s1078_s5  ;;  %v118_v7 = vsel %vm117_vm2, %v116_v59, %v1201_v40  ;;  %v442_v40 = vsel %vm160_vm0, %v1145_v18, 0 }
  0x92   :  { %851 = vmatprep.subr.bf16.mxu0 %v1039_v8  ;;  %v580_v14 = vsel %vm98_vm9, %v576_v4, %v577_v10  ;;  %vm119_vm5 = vcmp.ne.s16.totalorder %v118_v7, 0  ;;  %v937_v7 = vld [vmem:[%s1548_s2] sm:$0xff] }
  0x93   :  { %852 = vmatpush1.bf16.msra.mxu0 %v1038_v9  ;;  %v575_v15 = vpop.permute.xlu0 %574  ;;  %v1252_v17 = vpop.permute.xlu1 %203  ;;  %v581_v22 = vsel %vm321_vm11, %v569_v45, %v580_v14  ;;  %v109_v9 = vld [vmem:[%s1545_s0 + $0x8] sm:$0xf]  ;;  %v123_v39 = vsel %vm119_vm5, %v1122_v5, 0 }
  0x94   :  { %241 = vrot.lane.b32.xlu0 %v232_v11, %s1079_s14  ;;  %v579_v21 = vrot.slane %v575_v15, 4 }
  0x95   :  { %239 = vrot.lane.b32.xlu1 %v231_v19, %s1079_s14 }
  0x96   :  { %v582_v23 = vsel %vm98_vm9, %v578_v12, %v579_v21  ;;  %v443_v12 = vsel %vm1293_vm15, %v987_v3, 0  ;;  %vm361_vm15 = vcmask 769024  }
  0x97   :  { %v1265_v25 = vpop.permute.xlu0 %201  ;;  %v583_v26 = vsel %vm321_vm11, %v573_v54, %v582_v23  ;;  %v1268_v27 = vpop.permute.xlu1 %476  ;;  %v122_v23 = vsel %vm1343_vm3, %v109_v9, 0  ;;  %vm212_vm11 = vcmask 908288  }
  0x98   :  { %245 = vrot.lane.b32.xlu0 %v234_v24, %s1079_s14  ;;  %v1041_v30 = vcombine.high %v581_v22, %v583_v26  ;;  %v1040_v31 = vcombine.low %v581_v22, %v583_v26 }
  0x99   :  { %243 = vrot.lane.b32.xlu1 %v233_v28, %s1079_s14 }
  0x9a   :  { %894 = vmatprep.subr.bf16.mxu1 %v1041_v30  ;;  %v121_v30 = vsel %vm119_vm5, %v1114_v2, 0 }
  0x9b   :  { %895 = vmatpush1.bf16.msra.mxu1 %v1040_v31  ;;  %v1280_v35 = vpop.permute.xlu0 %205  ;;  %v1282_v36 = vpop.permute.xlu1 %480  ;;  %v111_v31 = vld [vmem:[%s1545_s0 + $0x14] sm:$0xf] }
  0x9c   :  { %510 = vrot.lane.b32.xlu0 %v501_v34, %s1079_s14 }
  0x9d   :  { %508 = vrot.lane.b32.xlu1 %v500_v37, %s1079_s14  ;;  %v124_v37 = vsel %vm1343_vm3, %v111_v31, 0 }
  0x9f   :  { %v1302_v45 = vpop.permute.xlu0 %478  ;;  %v87_v46 = vpop.permute.xlu1 %86 }
  0xa0   :  { %514 = vrot.lane.b32.xlu0 %v503_v44, %s1079_s14  ;;  %v94_v52 = vrot.slane %v87_v46, 4 }
  0xa1   :  { %512 = vrot.lane.b32.xlu1 %v502_v47, %s1079_s14  ;;  %v409_v47 = vsel %vm1343_vm3, %v981_v41, 0 }
  0xa3   :  { %v1310_v48 = vpop.permute.xlu0 %482  ;;  %v91_v49 = vpop.permute.xlu1 %90 }
  0xa4   :  { %172 = vrot.lane.b32.xlu0 %v163_v33, %s1080_s23  ;;  %v96_v61 = vrot.slane %v91_v49, 4  ;;  %v408_v33 = vsel %vm119_vm5, %v1135_v16, 0 }
  0xa5   :  { %170 = vrot.lane.b32.xlu1 %v162_v50, %s1080_s23 }
  0xa7   :  { %v89_v54 = vpop.permute.xlu0 %88  ;;  %v385_v58 = vpop.permute.xlu1 %384 }
  0xa8   :  { %176 = vrot.lane.b32.xlu0 %v165_v53, %s1080_s23  ;;  %v95_v57 = vrot.slane %v89_v54, 4  ;;  %v392_v11 = vrot.slane %v385_v58, 4  ;;  %v410_v54 = vsel %vm119_vm5, %v1145_v18, 0 }
  0xa9   :  { %174 = vrot.lane.b32.xlu1 %v164_v55, %s1080_s23 }
  0xaa   :  { %v99_v60 = vsel %vm98_vm9, %v94_v52, %v95_v57  ;;  %v330_v52 = vld [vmem:[%s1545_s0 + $0x8] sm:$0xf] }
  0xab   :  { %v1333_v63 = vsel %vm100_vm1, %v87_v46, %v99_v60  ;;  %v93_v0 = vpop.permute.xlu0 %92  ;;  %v389_v19 = vpop.permute.xlu1 %388  ;;  %v335_v46 = vrot.slane %v1210_v43, 4  ;;  %v1005_v60 = vld [vmem:[%s1545_s0 + $0x20] sm:$0xf] }
  0xac   :  { %450 = vrot.lane.b32.xlu0 %v441_v62, %s1080_s23  ;;  %v97_v4 = vrot.slane %v93_v0, 4  ;;  %v394_v26 = vrot.slane %v389_v19, 4  ;;  %v1007_v0 = vld [vmem:[%s1545_s0 + $0x2c] sm:$0xf] }
  0xad   :  { %448 = vrot.lane.b32.xlu1 %v440_v1, %s1080_s23  ;;  %v337_v50 = vsel %vm336_vm6, %v335_v46, %v1210_v43  ;;  %vm1399_vm7 = vcmp.ne.s16.totalorder %v335_v46, 0 }
  0xae   :  { %v102_v10 = vsel %vm98_vm9, %v96_v61, %v97_v4  ;;  %vm338_vm8 = vcmp.ne.s16.totalorder %v337_v50, 0  ;;  %v341_v43 = vsel %vm1399_vm7, %v330_v52, 0  ;;  %v343_v57 = vsel %vm1399_vm7, %v332_v56, 0  ;;  %v955_v4 = vld [vmem:[%s1547_s3] sm:$0xff] }
  0xaf   :  { %v1354_v14 = vsel %vm100_vm1, %v91_v49, %v102_v10  ;;  %v387_v15 = vpop.permute.xlu0 %386  ;;  %v983_v49 = vld [vmem:[%s1545_s0 + $0x2c] sm:$0xf]  ;;  %v340_v55 = vsel %vm338_vm8, %v1114_v2, 0  ;;  %v342_v59 = vsel %vm338_vm8, %v1122_v5, 0  ;;  %v593_v61 = vsel %vm1399_vm7, %v1005_v60, 0 }
  0xb0   :  { %454 = vrot.lane.b32.xlu0 %v443_v12, %s1080_s23  ;;  %v1014_v20 = vcombine.low %v1333_v63, %v1354_v14  ;;  %v1015_v21 = vcombine.high %v1333_v63, %v1354_v14  ;;  %v393_v22 = vrot.slane %v387_v15, 4  ;;  %v411_v53 = vsel %vm1343_vm3, %v983_v49, 0 }
  0xb1   :  { %452 = vrot.lane.b32.xlu1 %v442_v40, %s1080_s23  ;;  %v592_v62 = vsel %vm338_vm8, %v1135_v16, 0  ;;  %v595_v1 = vsel %vm1399_vm7, %v1007_v0, 0  ;;  %v594_v3 = vsel %vm338_vm8, %v1145_v18, 0  ;;  %v207_v49 = vrot.slane %v1243_v6, 4 }
  0xb2   :  { %v396_v24 = vsel %vm98_vm9, %v392_v11, %v393_v22  ;;  %v209_v50 = vrot.slane %v1252_v17, 4 }
  0xb3   :  { %v1368_v28 = vsel %vm100_vm1, %v385_v58, %v396_v24  ;;  %v391_v29 = vpop.permute.xlu0 %390  ;;  %v1068_v58 = vld [vmem:[%s1546_s1 + $0x4] ss:$8 sps:$4 sm:$0xff]  }
  0xb4   :  { %131 = vrot.lane.b32.xlu0 %v122_v23, %s1081_s6  ;;  %v395_v32 = vrot.slane %v391_v29, 4  ;;  %1046 = vmatprep.mubr.msk.bf16.mxu0 %vm158_vm14, %v1068_v58 }
  0xb5   :  { %129 = vrot.lane.b32.xlu1 %v121_v30, %s1081_s6  ;;  %1047 = vmatprep.mubr.msk.bf16.mxu1 %vm158_vm14, %v1068_v58  ;;  %vm142_vm14 = vcmask 1031168  }
  0xb6   :  { %v398_v34 = vsel %vm98_vm9, %v394_v26, %v395_v32 }
  0xb7   :  { %v1379_v38 = vsel %vm100_vm1, %v389_v19, %v398_v34 }
  0xb8   :  { %135 = vrot.lane.b32.xlu0 %v124_v37, %s1081_s6  ;;  %v1016_v42 = vcombine.low %v1368_v28, %v1379_v38  ;;  %v1017_v44 = vcombine.high %v1368_v28, %v1379_v38 }
  0xb9   :  { %133 = vrot.lane.b32.xlu1 %v123_v39, %s1081_s6 }
  0xbc   :  { %418 = vrot.lane.b32.xlu0 %v409_v47, %s1081_s6 }
  0xbd   :  { %416 = vrot.lane.b32.xlu1 %v408_v33, %s1081_s6 }
  0xc0   :  { %422 = vrot.lane.b32.xlu0 %v411_v53, %s1081_s6  ;;  %v208_v53 = vrot.slane %v1265_v25, 4 }
  0xc1   :  { %420 = vrot.lane.b32.xlu1 %v410_v54, %s1081_s6  ;;  %v210_v54 = vrot.slane %v1280_v35, 4 }
  0xc3   :  { %v214_v0 = vsel %vm98_vm9, %v209_v50, %v210_v54 }
  0xc4   :  { %350 = vrot.lane.b32.xlu0 %v341_v43, %s1082_s15 }
  0xc5   :  { %348 = vrot.lane.b32.xlu1 %v340_v55, %s1082_s15 }
  0xc8   :  { %354 = vrot.lane.b32.xlu0 %v343_v57, %s1082_s15 }
  0xc9   :  { %352 = vrot.lane.b32.xlu1 %v342_v59, %s1082_s15 }
  0xcc   :  { %602 = vrot.lane.b32.xlu0 %v593_v61, %s1082_s15 }
  0xcd   :  { %600 = vrot.lane.b32.xlu1 %v592_v62, %s1082_s15  ;;  %v211_v62 = vsel %vm98_vm9, %v207_v49, %v208_v53 }
  0xd0   :  { %606 = vrot.lane.b32.xlu0 %v595_v1, %s1082_s15 }
  0xd1   :  { %604 = vrot.lane.b32.xlu1 %v594_v3, %s1082_s15 }
  0xd4   :  { %958 = vperm.xlu0 %1065, %v955_v4   ;;  %v484_v4 = vrot.slane %v1268_v27, 4 }
  0xd5   :  { %940 = vperm.xlu1 %1064, %v937_v7   ;;  %v213_v7 = vsel %vm212_vm11, %v1243_v6, %v211_v62 }
  0xf6   :  { %v282_v8 = vpop.permute.xlu0 %281 }
  0xf7   :  { %v280_v9 = vpop.permute.xlu1 %279  ;;  %v288_v10 = vrot.slane %v282_v8, 4  ;;  %v215_v8 = vsel %vm212_vm11, %v1252_v17, %v214_v0 }
  0xf8   :  { %v287_v11 = vrot.slane %v280_v9, 4 }
  0xfa   :  { %v286_v12 = vpop.permute.xlu0 %285  ;;  %v291_v40 = vsel %vm98_vm9, %v287_v11, %v288_v10 }
  0xfb   :  { %v290_v15 = vrot.slane %v286_v12, 4  ;;  %v284_v19 = vpop.permute.xlu1 %283  ;;  %v293_v26 = vsel %vm292_vm10, %v280_v9, %v291_v40  ;;  %v486_v9 = vrot.slane %v1282_v36, 4  ;;  %v485_v12 = vrot.slane %v1302_v45, 4 }
  0xfc   :  { %v289_v22 = vrot.slane %v284_v19, 4 }
  0xfe   :  { %v294_v23 = vsel %vm98_vm9, %v289_v22, %v290_v15  ;;  %v543_v24 = vpop.permute.xlu0 %542  ;;  %v487_v15 = vrot.slane %v1310_v48, 4 }
  0xff   :  { %v295_v29 = vsel %vm292_vm10, %v284_v19, %v294_v23  ;;  %v541_v30 = vpop.permute.xlu1 %540  ;;  %v549_v34 = vrot.slane %v543_v24, 4 }
 0x100   :  { %v1034_v31 = vcombine.low %v293_v26, %v295_v29  ;;  %v1035_v32 = vcombine.high %v293_v26, %v295_v29  ;;  %v548_v37 = vrot.slane %v541_v30, 4  ;;  %v1027_v29 = vcombine.high %v213_v7, %v215_v8 }
 0x101   :  { %v490_v45 = vsel %vm98_vm9, %v486_v9, %v487_v15 }
 0x102   :  { %v547_v39 = vpop.permute.xlu0 %546  ;;  %853 = vmatprep.subr.bf16.mxu0 %v1035_v32  ;;  %v552_v47 = vsel %vm98_vm9, %v548_v37, %v549_v34  ;;  %v488_v32 = vsel %vm98_vm9, %v484_v4, %v485_v12  ;;  %v1026_v37 = vcombine.low %v213_v7, %v215_v8 }
 0x103   :  { %v551_v41 = vrot.slane %v547_v39, 4  ;;  %854 = vmatpush1.bf16.msra.mxu0 %v1034_v31  ;;  %v545_v46 = vpop.permute.xlu1 %544  ;;  %v553_v43 = vsel %vm292_vm10, %v541_v30, %v552_v47  ;;  %v491_v47 = vsel %vm212_vm11, %v1282_v36, %v490_v45 }
 0x104   :  { %v550_v33 = vrot.slane %v545_v46, 4 }
 0x106   :  { %v554_v51 = vsel %vm98_vm9, %v550_v33, %v551_v41  ;;  %v242_v52 = vpop.permute.xlu0 %241 }
 0x107   :  { %v555_v55 = vsel %vm292_vm10, %v545_v46, %v554_v51  ;;  %v240_v56 = vpop.permute.xlu1 %239  ;;  %v248_v59 = vrot.slane %v242_v52, 4  ;;  %v489_v46 = vsel %vm212_vm11, %v1268_v27, %v488_v32 }
 0x108   :  { %v1036_v57 = vcombine.low %v553_v43, %v555_v55  ;;  %v1037_v58 = vcombine.high %v553_v43, %v555_v55  ;;  %v247_v60 = vrot.slane %v240_v56, 4  ;;  %v1029_v43 = vcombine.high %v489_v46, %v491_v47 }
 0x10a   :  { %v246_v61 = vpop.permute.xlu0 %245  ;;  %896 = vmatprep.subr.bf16.mxu1 %v1037_v58  ;;  %v251_v35 = vsel %vm98_vm9, %v247_v60, %v248_v59  ;;  %v1028_v58 = vcombine.low %v489_v46, %v491_v47 }
 0x10b   :  { %v250_v1 = vrot.slane %v246_v61, 4  ;;  %897 = vmatpush1.bf16.msra.mxu1 %v1036_v57  ;;  %v244_v25 = vpop.permute.xlu1 %243  ;;  %v253_v19 = vsel %vm252_vm12, %v240_v56, %v251_v35 }
 0x10c   :  { %v249_v3 = vrot.slane %v244_v25, 4 }
 0x10e   :  { %v254_v10 = vsel %vm98_vm9, %v249_v3, %v250_v1  ;;  %v511_v11 = vpop.permute.xlu0 %510 }
 0x10f   :  { %v255_v40 = vsel %vm252_vm12, %v244_v25, %v254_v10  ;;  %v509_v22 = vpop.permute.xlu1 %508  ;;  %v517_v6 = vrot.slane %v511_v11, 4 }
 0x110   :  { %v1030_v23 = vcombine.low %v253_v19, %v255_v40  ;;  %v1031_v24 = vcombine.high %v253_v19, %v255_v40  ;;  %v516_v26 = vrot.slane %v509_v22, 4 }
 0x112   :  { %v515_v17 = vpop.permute.xlu0 %514  ;;  %855 = vmatprep.subr.bf16.mxu0 %v1031_v24  ;;  %v520_v48 = vsel %vm98_vm9, %v516_v26, %v517_v6 }
 0x113   :  { %v519_v30 = vrot.slane %v515_v17, 4  ;;  %856 = vmatpush1.bf16.msra.mxu0 %v1030_v23  ;;  %v513_v31 = vpop.permute.xlu1 %512  ;;  %v521_v33 = vsel %vm252_vm12, %v509_v22, %v520_v48 }
 0x114   :  { %v518_v34 = vrot.slane %v513_v31, 4  ;;  %857 = vmatprep.subr.bf16.mxu0 %v1027_v29 }
 0x116   :  { %v522_v39 = vsel %vm98_vm9, %v518_v34, %v519_v30  ;;  %v173_v41 = vpop.permute.xlu0 %172 }
 0x117   :  { %v523_v49 = vsel %vm252_vm12, %v513_v31, %v522_v39  ;;  %858 = vmatpush1.bf16.msra.mxu0 %v1026_v37  ;;  %v171_v50 = vpop.permute.xlu1 %170  ;;  %v179_v53 = vrot.slane %v173_v41, 4 }
 0x118   :  { %v1032_v51 = vcombine.low %v521_v33, %v523_v49  ;;  %v1033_v52 = vcombine.high %v521_v33, %v523_v49  ;;  %v178_v54 = vrot.slane %v171_v50, 4  ;;  %v74_v33 = vsel %vm1126_vm4, %v1114_v2, 0 }
 0x119   :  { %v75_v49 = vsel %vm1126_vm4, %v1122_v5, 0 }
 0x11a   :  { %v177_v55 = vpop.permute.xlu0 %176  ;;  %898 = vmatprep.subr.bf16.mxu1 %v1033_v52  ;;  %v182_v27 = vsel %vm98_vm9, %v178_v54, %v179_v53 }
 0x11b   :  { %v181_v56 = vrot.slane %v177_v55, 4  ;;  %899 = vmatpush1.bf16.msra.mxu1 %v1032_v51  ;;  %v175_v57 = vpop.permute.xlu1 %174  ;;  %v184_v61 = vsel %vm183_vm13, %v171_v50, %v182_v27  ;;  %v1010_v27 = vcombine.low %v74_v33, %v75_v49 }
 0x11c   :  { %v180_v36 = vrot.slane %v175_v57, 4  ;;  %900 = vmatprep.subr.bf16.mxu1 %v1029_v43  ;;  %v1011_v43 = vcombine.high %v74_v33, %v75_v49 }
 0x11e   :  { %v185_v59 = vsel %vm98_vm9, %v180_v36, %v181_v56  ;;  %v451_v60 = vpop.permute.xlu0 %450 }
 0x11f   :  { %v186_v62 = vsel %vm183_vm13, %v175_v57, %v185_v59  ;;  %901 = vmatpush1.bf16.msra.mxu1 %v1028_v58  ;;  %v449_v0 = vpop.permute.xlu1 %448  ;;  %v457_v35 = vrot.slane %v451_v60, 4 }
 0x120   :  { %v1022_v1 = vcombine.low %v184_v61, %v186_v62  ;;  %v1023_v25 = vcombine.high %v184_v61, %v186_v62  ;;  %v456_v3 = vrot.slane %v449_v0, 4  ;;  %v373_v61 = vsel %vm1126_vm4, %v1145_v18, 0 }
 0x122   :  { %v455_v4 = vpop.permute.xlu0 %454  ;;  %859 = vmatprep.subr.bf16.mxu0 %v1023_v25  ;;  %v460_v9 = vsel %vm98_vm9, %v456_v3, %v457_v35 }
 0x123   :  { %v459_v7 = vrot.slane %v455_v4, 4  ;;  %860 = vmatpush1.bf16.msra.mxu0 %v1022_v1  ;;  %v453_v8 = vpop.permute.xlu1 %452  ;;  %v461_v15 = vsel %vm183_vm13, %v449_v0, %v460_v9 }
 0x124   :  { %v458_v10 = vrot.slane %v453_v8, 4 }
 0x126   :  { %v462_v11 = vsel %vm98_vm9, %v458_v10, %v459_v7  ;;  %v132_v12 = vpop.permute.xlu0 %131  ;;  %v1066_v10 = vld [vmem:[%s1546_s1] ss:$8 sps:$4 sm:$0xff]  }
 0x127   :  { %v463_v19 = vsel %vm183_vm13, %v453_v8, %v462_v11  ;;  %v130_v40 = vpop.permute.xlu1 %129  ;;  %v138_v24 = vrot.slane %v132_v12, 4 }
 0x128   :  { %v1024_v22 = vcombine.low %v461_v15, %v463_v19  ;;  %v1025_v23 = vcombine.high %v461_v15, %v463_v19  ;;  %v137_v6 = vrot.slane %v130_v40, 4 }
 0x12a   :  { %v136_v26 = vpop.permute.xlu0 %135  ;;  %902 = vmatprep.subr.bf16.mxu1 %v1025_v23  ;;  %v141_v30 = vsel %vm98_vm9, %v137_v6, %v138_v24 }
 0x12b   :  { %v140_v29 = vrot.slane %v136_v26, 4  ;;  %903 = vmatpush1.bf16.msra.mxu1 %v1024_v22  ;;  %v134_v17 = vpop.permute.xlu1 %133  ;;  %v143_v48 = vsel %vm142_vm14, %v130_v40, %v141_v30 }
 0x12c   :  { %v139_v31 = vrot.slane %v134_v17, 4 }
 0x12e   :  { %v144_v32 = vsel %vm98_vm9, %v139_v31, %v140_v29  ;;  %v419_v45 = vpop.permute.xlu0 %418 }
 0x12f   :  { %v145_v34 = vsel %vm142_vm14, %v134_v17, %v144_v32  ;;  %v417_v37 = vpop.permute.xlu1 %416  ;;  %v425_v46 = vrot.slane %v419_v45, 4 }
 0x130   :  { %v1018_v39 = vcombine.low %v143_v48, %v145_v34  ;;  %v1019_v41 = vcombine.high %v143_v48, %v145_v34  ;;  %v424_v47 = vrot.slane %v417_v37, 4 }
 0x132   :  { %v423_v50 = vpop.permute.xlu0 %422  ;;  %861 = vmatprep.subr.bf16.mxu0 %v1019_v41  ;;  %v428_v53 = vsel %vm98_vm9, %v424_v47, %v425_v46 }
 0x133   :  { %v427_v51 = vrot.slane %v423_v50, 4  ;;  %862 = vmatpush1.bf16.msra.mxu0 %v1018_v39  ;;  %v421_v52 = vpop.permute.xlu1 %420  ;;  %v429_v56 = vsel %vm142_vm14, %v417_v37, %v428_v53 }
 0x134   :  { %v426_v54 = vrot.slane %v421_v52, 4  ;;  %863 = vmatprep.subr.bf16.mxu0 %v1015_v21  ;;  %v372_v21 = vsel %vm1126_vm4, %v1135_v16, 0 }
 0x135   :  { %v1013_v1 = vcombine.high %v372_v21, %v373_v61  ;;  %v1012_v3 = vcombine.low %v372_v21, %v373_v61 }
 0x136   :  { %v430_v55 = vsel %vm98_vm9, %v426_v54, %v427_v51  ;;  %v351_v2 = vpop.permute.xlu0 %350 }
 0x137   :  { %v431_v5 = vsel %vm142_vm14, %v421_v52, %v430_v55  ;;  %864 = vmatpush1.bf16.msra.mxu0 %v1014_v20  ;;  %v349_v57 = vpop.permute.xlu1 %348  ;;  %v357_v59 = vrot.slane %v351_v2, 4 }
 0x138   :  { %v1020_v36 = vcombine.low %v429_v56, %v431_v5  ;;  %v1021_v58 = vcombine.high %v429_v56, %v431_v5  ;;  %v356_v60 = vrot.slane %v349_v57, 4  ;;  %865 = vmatprep.subr.bf16.mxu0 %v1011_v43 }
 0x13a   :  { %v355_v62 = vpop.permute.xlu0 %354  ;;  %904 = vmatprep.subr.bf16.mxu1 %v1021_v58  ;;  %v360_v14 = vsel %vm98_vm9, %v356_v60, %v357_v59 }
 0x13b   :  { %v359_v0 = vrot.slane %v355_v62, 4  ;;  %905 = vmatpush1.bf16.msra.mxu1 %v1020_v36  ;;  %v353_v63 = vpop.permute.xlu1 %352  ;;  %866 = vmatpush1.bf16.msra.mxu0 %v1010_v27  ;;  %v362_v13 = vsel %vm361_vm15, %v349_v57, %v360_v14 }
 0x13c   :  { %v358_v20 = vrot.slane %v353_v63, 4  ;;  %906 = vmatprep.subr.bf16.mxu1 %v1017_v44 }
 0x13e   :  { %v363_v16 = vsel %vm98_vm9, %v358_v20, %v359_v0  ;;  %v603_v25 = vpop.permute.xlu0 %602 }
 0x13f   :  { %v364_v18 = vsel %vm361_vm15, %v353_v63, %v363_v16  ;;  %907 = vmatpush1.bf16.msra.mxu1 %v1016_v42  ;;  %v601_v35 = vpop.permute.xlu1 %600  ;;  %v609_v8 = vrot.slane %v603_v25, 4 }
 0x140   :  { %v1042_v4 = vcombine.low %v362_v13, %v364_v18  ;;  %v1043_v7 = vcombine.high %v362_v13, %v364_v18  ;;  %v608_v9 = vrot.slane %v601_v35, 4  ;;  %908 = vmatprep.subr.bf16.mxu1 %v1013_v1 }
 0x142   :  { %v607_v44 = vpop.permute.xlu0 %606  ;;  %881 = vmatprep.subr.bf16.mxu0 %v1043_v7  ;;  %v612_v28 = vsel %vm98_vm9, %v608_v9, %v609_v8 }
 0x143   :  { %v611_v11 = vrot.slane %v607_v44, 4  ;;  %v605_v12 = vpop.permute.xlu1 %604  ;;  %882 = vmatpush2.bf16.msra.mxu0 %v1042_v4  ;;  %909 = vmatpush1.bf16.msra.mxu1 %v1012_v3  ;;  %v613_v15 = vsel %vm361_vm15, %v601_v35, %v612_v28 }
 0x144   :  { %v610_v38 = vrot.slane %v605_v12, 4 }
 0x146   :  { %v614_v42 = vsel %vm98_vm9, %v610_v38, %v611_v11  ;;  %884 = vmatmul.mubr.bf16.vlgmr.msra.gmra.mxu0 %v1066_v10 }
 0x147   :  { %v615_v19 = vsel %vm361_vm15, %v605_v12, %v614_v42 }
 0x148   :  { %v1044_v40 = vcombine.low %v613_v15, %v615_v19  ;;  %v1045_v22 = vcombine.high %v613_v15, %v615_v19 }
 0x14a   :  { %924 = vmatprep.subr.bf16.mxu1 %v1045_v22 }
 0x14b   :  { %925 = vmatpush2.bf16.msra.mxu1 %v1044_v40 }
 0x14e   :  { %927 = vmatmul.mubr.bf16.vlgmr.msra.gmra.mxu1 %v1066_v10 }
 0x14f   :  { %v959_v31 = vpop.permute.xlu0 %958 }
 0x150   :  { %v941_v23 = vpop.permute.xlu1 %940 }
 0x206   :  { %v885_v24 = vpop.f32.mrf.mxu0 }
 0x207   :  { %v943_v6 = vadd.f32 %v941_v23, %v885_v24 }
 0x208   :  { %v887_v26 = vpop.f32.mrf.mxu0 }
 0x209   :  { %v944_v29 = vadd.f32 %v941_v23, %v887_v26  ;;  %v947_v17 = vmax.f32 %v943_v6, 0.0 }
 0x20a   :  { %v889_v30 = vpop.f32.mrf.mxu0 }
 0x20b   :  { %v948_v32 = vmax.f32 %v944_v29, 0.0  ;;  %v951_v45 = vadd.f32 %v947_v17, %v889_v30 }
 0x20c   :  { %v891_v48 = vpop.f32.mrf.mxu0 }
 0x20d   :  { %v952_v34 = vadd.f32 %v948_v32, %v891_v48  ;;  %v961_v37 = vadd.f32 %v959_v31, %v951_v45 }
 0x20e   :  { %v928_v39 = vpop.f32.mrf.mxu1 }
 0x20f   :  { %v945_v41 = vadd.f32 %v941_v23, %v928_v39  ;;  %v962_v46 = vadd.f32 %v959_v31, %v952_v34  ;;  %965 = vst [vmem:[%s1549_s4] sm:$0xff] %v961_v37 }
 0x210   :  { %v930_v47 = vpop.f32.mrf.mxu1 }
 0x211   :  { %v949_v33 = vmax.f32 %v945_v41, 0.0  ;;  %966 = vst [vmem:[%s1549_s4 + $0x8] sm:$0xff] %v962_v46  ;;  %v946_v49 = vadd.f32 %v941_v23, %v930_v47 }
 0x212   :  { %v932_v50 = vpop.f32.mrf.mxu1 }
 0x213   :  { %v950_v51 = vmax.f32 %v946_v49, 0.0  ;;  %v953_v52 = vadd.f32 %v949_v33, %v932_v50 }
 0x214   :  { %v934_v53 = vpop.f32.mrf.mxu1 }
 0x215   :  { %v963_v54 = vadd.f32 %v959_v31, %v953_v52  ;;  %v954_v43 = vadd.f32 %v950_v51, %v934_v53 }
 0x217   :  { %1048 = vst [vmem:[%s1549_s4 + $0x10] sm:$0xff] %v963_v54  ;;  %v964_v55 = vadd.f32 %v959_v31, %v954_v43 }
 0x219   :  { %1049 = vst [vmem:[%s1549_s4 + $0x18] sm:$0xff] %v964_v55 }

</bundles_post_ra>
